<compile_context>
chip_gen: v6e
topology: v6e:2x2x1
jax: 0.10.0
libtpu: 0.0.40
codegen_flags: <defaults>
</compile_context>

<pallas_src>
import functools

import jax
import jax.numpy as jnp
from jax.experimental import pallas as pl
from jax.experimental.pallas import tpu as pltpu

NUM_CLASSES = 7

# rev_matrix from the module __init__ (deterministic constant).
_REV = [
    [0.05, -0.2, -0.2, -0.2, -0.2, -0.2, -0.2],
    [-0.25, 1.0, -0.3, -0.1, -0.1, -0.1, -0.1],
    [-0.02, -0.1, 1.0, -0.1, -0.1, -0.1, -0.1],
    [-0.25, -0.1, -0.3, 1.0, -0.1, -0.1, -0.1],
    [-0.25, -0.1, -0.3, -0.1, 1.0, -0.1, -0.1],
    [-0.25, -0.1, -0.3, -0.1, -0.1, 1.0, -0.1],
    [-0.25, -0.1, -0.3, -0.1, -0.1, -0.1, 1.0],
]
REV_MATRIX = jnp.array(_REV, dtype=jnp.float32)

# Closed-form cost constants: cost = REV[tl, tl] - REV[tl, il].
_C_TL0     = _REV[0][0] - _REV[0][1]   # tl == 0, il != tl          -> 0.25
_C_TL2_IL0 = _REV[2][2] - _REV[2][0]   # tl == 2, il == 0           -> 1.02
_C_TLx_IL0 = _REV[1][1] - _REV[1][0]   # tl in {1,3..6}, il == 0    -> 1.25
_C_TLx_IL2 = _REV[1][1] - _REV[1][2]   # tl in {1,3..6}, il == 2    -> 1.30
_C_ELSE    = _REV[1][1] - _REV[1][3]   # any other il != tl         -> 1.10


def _cost_closed_form(tl, il):
    if il == tl:
        return 0.0
    if tl == 0:
        return _C_TL0
    if il == 0:
        return _C_TL2_IL0 if tl == 2 else _C_TLx_IL0
    if il == 2:
        return _C_TLx_IL2
    return _C_ELSE


# Exhaustively verify the closed form against REV at import time (compile-time only).
for _a in range(NUM_CLASSES):
    for _b in range(NUM_CLASSES):
        assert abs(_cost_closed_form(_a, _b) - (_REV[_a][_a] - _REV[_a][_b])) < 1e-12


def _round_up(x, m):
    return (x + m - 1) // m * m


def _bird_ce_kernel(x_ref, t_ref, ig_ref, out_ref, *, n_valid):
    """One lane-dense tile: batch on lanes, classes on sublanes.

    x_ref, t_ref : (C, tn) logits / soft targets
    ig_ref       : (1, tn) int8, 1 where ignored (boundary lanes may be garbage)
    out_ref      : (1, 128) f32, per-tile partial sum broadcast across lanes
    """
    tn = x_ref.shape[1]
    x = x_ref[...].astype(jnp.float32)            # upcast post-DMA (bf16-friendly)
    t = t_ref[...].astype(jnp.float32)

    # --- class-axis (sublane, lane-local) reductions: log-sum-exp + soft CE ---
    m = jnp.max(x, axis=0, keepdims=True)                                  # (1, tn)
    lse = jnp.log(jnp.sum(jnp.exp(x - m), axis=0, keepdims=True))          # (1, tn)
    tsum = jnp.sum(t, axis=0, keepdims=True)
    txsum = jnp.sum(t * x, axis=0, keepdims=True)
    ce = tsum * (m + lse) - txsum                                          # (1, tn)

    # --- first-max argmaxes: min class index among the maxima (reuses m) ---
    idx = jax.lax.broadcasted_iota(jnp.int32, x.shape, 0).astype(jnp.float32)
    sentinel = jnp.float32(NUM_CLASSES)
    il = jnp.min(jnp.where(x == m, idx, sentinel), axis=0, keepdims=True)  # (1, tn)
    t_max = jnp.max(t, axis=0, keepdims=True)
    tl = jnp.min(jnp.where(t == t_max, idx, sentinel), axis=0, keepdims=True)

    # --- cost = REV[tl, tl] - REV[tl, il], closed form (REV baked in) ---
    cost = jnp.where(
        il == tl, 0.0,
        jnp.where(tl == 0.0, _C_TL0,
                  jnp.where(il == 0.0,
                            jnp.where(tl == 2.0, _C_TL2_IL0, _C_TLx_IL0),
                            jnp.where(il == 2.0, _C_TLx_IL2, _C_ELSE))))

    # --- mask: not-ignored AND column < n (boundary tile lanes are OOB garbage) ---
    keep = ig_ref[...].astype(jnp.int32) == 0                              # (1, tn)
    col = jax.lax.broadcasted_iota(jnp.int32, (1, tn), 1) + pl.program_id(0) * tn
    wloss = jnp.where(jnp.logical_and(keep, col < n_valid),
                      (1.0 + cost) * ce, 0.0)

    # Per-tile partial sum, lane-broadcast into the lane-dense output block.
    out_ref[...] = jnp.broadcast_to(
        jnp.sum(wloss, axis=1, keepdims=True), out_ref.shape)


def bird_cross_entropy_loss(inp, target, ignored, *, block_n=32768):
    """inp, target: (N, C) float; ignored: (N,) bool/int. Returns scalar f32 loss."""
    n, c = inp.shape
    assert c == NUM_CLASSES

    # Lane-dense layout: batch -> lanes, classes -> sublanes.
    # (Wrapper transpose = one extra HBM read+write per input; kept for robustness.)
    x_t = jnp.transpose(inp)                                  # (C, N)
    t_t = jnp.transpose(target)                               # (C, N)
    ig = jnp.asarray(ignored, dtype=jnp.int8).reshape(1, n)   # (1, N), 1 B/sample

    tn = min(block_n, _round_up(n, 128))
    if n > 128:
        # Keep >= 2 grid steps when possible so the "parallel" axis spans both
        # TensorCores on megacore parts (v7x).
        tn = min(tn, _round_up(pl.cdiv(n, 2), 128))
    num_tiles = pl.cdiv(n, tn)

    kernel = functools.partial(_bird_ce_kernel, n_valid=n)

    partials = pl.pallas_call(
        kernel,
        out_shape=jax.ShapeDtypeStruct((1, num_tiles * 128), jnp.float32),
        grid_spec=pltpu.PrefetchScalarGridSpec(
            num_scalar_prefetch=0,
            grid=(num_tiles,),
            in_specs=[
                pl.BlockSpec((NUM_CLASSES, tn), lambda i: (0, i)),
                pl.BlockSpec((NUM_CLASSES, tn), lambda i: (0, i)),
                pl.BlockSpec((1, tn), lambda i: (0, i)),
            ],
            out_specs=pl.BlockSpec((1, 128), lambda i: (0, i)),
        ),
        compiler_params=pltpu.CompilerParams(
            dimension_semantics=("parallel",),
        ),
    )(x_t, t_t, ig)

    # One f32 partial per tile (replicated across its 128 lanes); finish mean here.
    per_tile = partials.reshape(num_tiles, 128)[:, 0]
    return jnp.sum(per_tile) / jnp.float32(n)


def _reference(inp, target, ignored):
    logp = jax.nn.log_softmax(inp.astype(jnp.float32), axis=1)
    ce = -jnp.sum(target.astype(jnp.float32) * logp, axis=1)
    il = jnp.argmax(inp, axis=1)
    tl = jnp.argmax(target, axis=1)
    wanted = REV_MATRIX[tl, tl]
    actual = REV_MATRIX[tl, il]
    cost = wanted - actual
    return jnp.mean((1.0 + cost) * ce * (1.0 - ignored.astype(jnp.float32)))


if __name__ == "__main__":
    key = jax.random.PRNGKey(0)
    k1, k2, k3 = jax.random.split(key, 3)

    N, C = 8, NUM_CLASSES
    logits = jax.random.normal(k1, (N, C), dtype=jnp.float32)
    target = jax.nn.softmax(jax.random.normal(k2, (N, C), dtype=jnp.float32), axis=1)
    ignored = jax.random.bernoulli(k3, p=0.25, shape=(N,))

    loss = bird_cross_entropy_loss(logits, target, ignored)
    jax.block_until_ready(loss)
    ref = _reference(logits, target, ignored)
    assert jnp.allclose(loss, ref, rtol=1e-4, atol=1e-5), (loss, ref)

    # Multi-tile grid + boundary clipping (N not a multiple of the tile width).
    k4, k5, k6 = jax.random.split(jax.random.PRNGKey(1), 3)
    N2 = 200
    logits2 = jax.random.normal(k4, (N2, C), dtype=jnp.float32)
    target2 = jax.nn.softmax(jax.random.normal(k5, (N2, C), dtype=jnp.float32), axis=1)
    ignored2 = jax.random.bernoulli(k6, p=0.25, shape=(N2,))
    loss2 = bird_cross_entropy_loss(logits2, target2, ignored2, block_n=128)
    jax.block_until_ready(loss2)
    ref2 = _reference(logits2, target2, ignored2)
    assert jnp.allclose(loss2, ref2, rtol=1e-4, atol=1e-5), (loss2, ref2)

    print("KERNEL_OK")
</pallas_src>

<mosaic_0001>
module attributes {stable_mosaic.version = 11 : i64} {
  func.func @_bird_ce_kernel(%arg0: i32, %arg1: memref<7x128xf32, #tpu.memory_space<vmem>>, %arg2: memref<7x128xf32, #tpu.memory_space<vmem>>, %arg3: memref<1x128xi8, #tpu.memory_space<vmem>>, %arg4: memref<1x128xf32, #tpu.memory_space<vmem>>) attributes {dimension_semantics = [#tpu.dimension_semantics<parallel>], iteration_bounds = array<i64: 1>, scalar_prefetch = 0 : i64, scratch_operands = 0 : i64, tpu.core_type = #tpu.core_type<tc>, window_params = [{transform_indices = @transform_0, window_bounds = array<i64: 7, 128>}, {transform_indices = @transform_1, window_bounds = array<i64: 7, 128>}, {transform_indices = @transform_2, window_bounds = array<i64: 1, 128>}, {transform_indices = @transform_3, window_bounds = array<i64: 1, 128>}]} {
    %c0 = arith.constant 0 : index
    %c0_0 = arith.constant 0 : index
    %0 = vector.load %arg1[%c0, %c0_0] : memref<7x128xf32, #tpu.memory_space<vmem>>, vector<7x128xf32>
    %c0_1 = arith.constant 0 : index
    %c0_2 = arith.constant 0 : index
    %1 = vector.load %arg2[%c0_1, %c0_2] : memref<7x128xf32, #tpu.memory_space<vmem>>, vector<7x128xf32>
    %cst = arith.constant dense<0xFF800000> : vector<128xf32>
    %2 = vector.multi_reduction <maximumf>, %0, %cst [0] : vector<7x128xf32> to vector<128xf32>
    %3 = vector.shape_cast %2 : vector<128xf32> to vector<1x128xf32>
    %4 = vector.broadcast %3 : vector<1x128xf32> to vector<7x128xf32>
    %5 = arith.subf %0, %4 : vector<7x128xf32>
    %6 = math.exp %5 : vector<7x128xf32>
    %cst_3 = arith.constant dense<0.000000e+00> : vector<128xf32>
    %7 = vector.multi_reduction <add>, %6, %cst_3 [0] : vector<7x128xf32> to vector<128xf32>
    %8 = vector.shape_cast %7 : vector<128xf32> to vector<1x128xf32>
    %9 = math.log %8 : vector<1x128xf32>
    %cst_4 = arith.constant dense<0.000000e+00> : vector<128xf32>
    %10 = vector.multi_reduction <add>, %1, %cst_4 [0] : vector<7x128xf32> to vector<128xf32>
    %11 = vector.shape_cast %10 : vector<128xf32> to vector<1x128xf32>
    %12 = arith.mulf %1, %0 : vector<7x128xf32>
    %cst_5 = arith.constant dense<0.000000e+00> : vector<128xf32>
    %13 = vector.multi_reduction <add>, %12, %cst_5 [0] : vector<7x128xf32> to vector<128xf32>
    %14 = vector.shape_cast %13 : vector<128xf32> to vector<1x128xf32>
    %15 = arith.addf %3, %9 : vector<1x128xf32>
    %16 = arith.mulf %11, %15 : vector<1x128xf32>
    %17 = arith.subf %16, %14 : vector<1x128xf32>
    %18 = tpu.iota {dimensions = array<i32: 0>} : vector<7x128xi32>
    %19 = arith.sitofp %18 : vector<7x128xi32> to vector<7x128xf32>
    %20 = vector.broadcast %3 : vector<1x128xf32> to vector<7x128xf32>
    %21 = arith.cmpf oeq, %0, %20 : vector<7x128xf32>
    %cst_6 = arith.constant 7.000000e+00 : f32
    %22 = vector.broadcast %cst_6 : f32 to vector<7x128xf32>
    %23 = arith.select %21, %19, %22 : vector<7x128xi1>, vector<7x128xf32>
    %cst_7 = arith.constant dense<0x7F800000> : vector<128xf32>
    %24 = vector.multi_reduction <minimumf>, %23, %cst_7 [0] : vector<7x128xf32> to vector<128xf32>
    %25 = vector.shape_cast %24 : vector<128xf32> to vector<1x128xf32>
    %cst_8 = arith.constant dense<0xFF800000> : vector<128xf32>
    %26 = vector.multi_reduction <maximumf>, %1, %cst_8 [0] : vector<7x128xf32> to vector<128xf32>
    %27 = vector.shape_cast %26 : vector<128xf32> to vector<1x128xf32>
    %28 = vector.broadcast %27 : vector<1x128xf32> to vector<7x128xf32>
    %29 = arith.cmpf oeq, %1, %28 : vector<7x128xf32>
    %cst_9 = arith.constant 7.000000e+00 : f32
    %30 = vector.broadcast %cst_9 : f32 to vector<7x128xf32>
    %31 = arith.select %29, %19, %30 : vector<7x128xi1>, vector<7x128xf32>
    %cst_10 = arith.constant dense<0x7F800000> : vector<128xf32>
    %32 = vector.multi_reduction <minimumf>, %31, %cst_10 [0] : vector<7x128xf32> to vector<128xf32>
    %33 = vector.shape_cast %32 : vector<128xf32> to vector<1x128xf32>
    %34 = arith.cmpf oeq, %25, %33 : vector<1x128xf32>
    %cst_11 = arith.constant 0.000000e+00 : f32
    %35 = vector.broadcast %cst_11 : f32 to vector<1x128xf32>
    %36 = arith.cmpf oeq, %33, %35 : vector<1x128xf32>
    %cst_12 = arith.constant 0.000000e+00 : f32
    %37 = vector.broadcast %cst_12 : f32 to vector<1x128xf32>
    %38 = arith.cmpf oeq, %25, %37 : vector<1x128xf32>
    %cst_13 = arith.constant 2.000000e+00 : f32
    %39 = vector.broadcast %cst_13 : f32 to vector<1x128xf32>
    %40 = arith.cmpf oeq, %33, %39 : vector<1x128xf32>
    %cst_14 = arith.constant 1.020000e+00 : f32
    %cst_15 = arith.constant 1.250000e+00 : f32
    %41 = vector.broadcast %cst_14 : f32 to vector<1x128xf32>
    %42 = vector.broadcast %cst_15 : f32 to vector<1x128xf32>
    %43 = arith.select %40, %41, %42 : vector<1x128xi1>, vector<1x128xf32>
    %cst_16 = arith.constant 2.000000e+00 : f32
    %44 = vector.broadcast %cst_16 : f32 to vector<1x128xf32>
    %45 = arith.cmpf oeq, %25, %44 : vector<1x128xf32>
    %cst_17 = arith.constant 1.300000e+00 : f32
    %cst_18 = arith.constant 1.100000e+00 : f32
    %46 = vector.broadcast %cst_17 : f32 to vector<1x128xf32>
    %47 = vector.broadcast %cst_18 : f32 to vector<1x128xf32>
    %48 = arith.select %45, %46, %47 : vector<1x128xi1>, vector<1x128xf32>
    %49 = arith.select %38, %43, %48 : vector<1x128xi1>, vector<1x128xf32>
    %cst_19 = arith.constant 2.500000e-01 : f32
    %50 = vector.broadcast %cst_19 : f32 to vector<1x128xf32>
    %51 = arith.select %36, %50, %49 : vector<1x128xi1>, vector<1x128xf32>
    %cst_20 = arith.constant 0.000000e+00 : f32
    %52 = vector.broadcast %cst_20 : f32 to vector<1x128xf32>
    %53 = arith.select %34, %52, %51 : vector<1x128xi1>, vector<1x128xf32>
    %c0_21 = arith.constant 0 : index
    %c0_22 = arith.constant 0 : index
    %54 = vector.load %arg3[%c0_21, %c0_22] : memref<1x128xi8, #tpu.memory_space<vmem>>, vector<1x128xi8>
    %55 = arith.extsi %54 : vector<1x128xi8> to vector<1x128xi32>
    %c0_i32 = arith.constant 0 : i32
    %56 = vector.broadcast %c0_i32 : i32 to vector<1x128xi32>
    %57 = arith.cmpi eq, %55, %56 : vector<1x128xi32>
    %58 = tpu.iota {dimensions = array<i32: 1>} : vector<1x128xi32>
    %c128_i32 = arith.constant 128 : i32
    %59 = arith.muli %arg0, %c128_i32 : i32
    %60 = vector.broadcast %59 : i32 to vector<1x128xi32>
    %61 = arith.addi %58, %60 : vector<1x128xi32>
    %c8_i32 = arith.constant 8 : i32
    %62 = vector.broadcast %c8_i32 : i32 to vector<1x128xi32>
    %63 = arith.cmpi slt, %61, %62 : vector<1x128xi32>
    %64 = arith.andi %57, %63 : vector<1x128xi1>
    %cst_23 = arith.constant 1.000000e+00 : f32
    %65 = vector.broadcast %cst_23 : f32 to vector<1x128xf32>
    %66 = arith.addf %65, %53 : vector<1x128xf32>
    %67 = arith.mulf %66, %17 : vector<1x128xf32>
    %cst_24 = arith.constant 0.000000e+00 : f32
    %68 = vector.broadcast %cst_24 : f32 to vector<1x128xf32>
    %69 = arith.select %64, %67, %68 : vector<1x128xi1>, vector<1x128xf32>
    %cst_25 = arith.constant dense<0.000000e+00> : vector<1xf32>
    %70 = vector.multi_reduction <add>, %69, %cst_25 [1] : vector<1x128xf32> to vector<1xf32>
    %71 = vector.shape_cast %70 : vector<1xf32> to vector<1x1xf32>
    %72 = vector.shape_cast %71 : vector<1x1xf32> to vector<1x1xf32>
    %73 = vector.broadcast %72 : vector<1x1xf32> to vector<1x128xf32>
    %c0_26 = arith.constant 0 : index
    %c0_27 = arith.constant 0 : index
    %74 = vector.load %arg4[%c0_26, %c0_27] : memref<1x128xf32, #tpu.memory_space<vmem>>, vector<1x128xf32>
    tpu.vector_store %arg4[%c0_26, %c0_27], %73 {strides = array<i32>} : memref<1x128xf32, #tpu.memory_space<vmem>>, vector<1x128xf32>,
    return
  }
  func.func @transform_0(%arg0: i32) -> (i32, i32) {
    %c0_i32 = arith.constant 0 : i32
    %c0_i32_0 = arith.constant 0 : i32
    return %c0_i32, %arg0 : i32, i32
  }
  func.func @transform_1(%arg0: i32) -> (i32, i32) {
    %c0_i32 = arith.constant 0 : i32
    %c0_i32_0 = arith.constant 0 : i32
    return %c0_i32, %arg0 : i32, i32
  }
  func.func @transform_2(%arg0: i32) -> (i32, i32) {
    %c0_i32 = arith.constant 0 : i32
    %c0_i32_0 = arith.constant 0 : i32
    return %c0_i32, %arg0 : i32, i32
  }
  func.func @transform_3(%arg0: i32) -> (i32, i32) {
    %c0_i32 = arith.constant 0 : i32
    %c0_i32_0 = arith.constant 0 : i32
    return %c0_i32, %arg0 : i32, i32
  }
}

</mosaic_0001>

<bundles_post_ra>
// kernel: tpu_custom_call.1
= control target key start
LH: loop header
LB: loop body
LE: loop exit
PB: predicated region body
PF: predicated region fallthrough
CT: control target
= control target key end

     0   :  { %8 = vsyncpa [#allocation3], 0  ;;  %s277_s0 = inlined_call_operand.hbm [shape: f32[7,8], index: 0, kind: input, shape index: {}]   ;;  %s278_s1 = inlined_call_operand.hbm [shape: f32[7,8], index: 1, kind: input, shape index: {}]   ;;  %s279_s2 = inlined_call_operand.vmem [shape: s8[1,8], index: 2, kind: input, shape index: {}]   ;;  %s280_s3 = inlined_call_operand.hbm [shape: f32[1,128], index: 3, kind: output, shape index: {}]  }
   0x1   :  { %9 = vsyncpa [#allocation6], 0 }
   0x2   :  { %10 = vsyncpa [#allocation4], 0  ;;  %s226_s12 = smov [#allocation2]   ;;  %s227_s14 = smov [#allocation5]  }
   0x3   :  { %s17_s13 = sshll.u32 %s226_s12, 4  ;;  %s27_s15 = sshll.u32 %s227_s14, 4  ;;  %s18_s13 = int_to_ptr.vmem [resolvable:$true] %s17_s13  ;;  %s28_s15 = int_to_ptr.vmem [resolvable:$true] %s27_s15 }
   0x4   :  { %s168_s16 = scalar_lea.vmem %s18_s13, 128  ;;  %p173_p1 = scmp.lt.s32.totalorder %s18_s13, %s18_s13 }
   0x5   :  { %p169_p0 = scmp.ne.s32.totalorder %s18_s13, %s168_s16  ;;  %p174_p2 = scmp.lt.s32.totalorder %s168_s16, %s168_s16 }
   0x7   :  { %p175_p3 = por %p174_p2, %p173_p1 }
   0x9   :  { %p176_p4 = pnand %p175_p3, %p169_p0 }
   0xb   :  { %179 = shalt.err (!%p176_p4)
}
   0xc   :  { %20 = dma.hbm_to_vmem [thread:$0]  %s277_s0, 128, %s18_s13, [#allocation3]  }
   0xd   :  { %s188_s19 = scalar_lea.vmem %s28_s15, 128  ;;  %p193_p6 = scmp.lt.s32.totalorder %s28_s15, %s28_s15 }
   0xe   :  { %p189_p5 = scmp.ne.s32.totalorder %s28_s15, %s188_s19  ;;  %p194_p7 = scmp.lt.s32.totalorder %s188_s19, %s188_s19 }
  0x10   :  { %p195_p8 = por %p194_p7, %p193_p6 }
  0x12   :  { %p196_p9 = pnand %p195_p8, %p189_p5 }
  0x14   :  { %199 = shalt.err (!%p196_p9)
}
  0x15   :  { %30 = dma.hbm_to_vmem [thread:$0]  %s278_s1, 128, %s28_s15, [#allocation6]  }
  0x16   :  { %220 = dma.done.wait [#allocation3], 128  }
  0x17   :  { %221 = vsyncadd [#allocation3], 4294967168 }
  0x18   :  { %222 = dma.done.wait [#allocation6], 128  }
  0x19   :  { %223 = vsyncadd [#allocation6], 4294967168  ;;  %vm41_vm0 = vcmask 1046528   ;;  %v39_v0 = vld [vmem:[#allocation2] sm:$0x7f]  ;;  %v79_v9 = vlaneseq  ;;  %v228_v55 = vmov 1.25  }
  0x1a   :  { %v40_v1 = vld [vmem:[#allocation5] sm:$0x7f]  ;;  %v42_v2 = vsel %vm41_vm0, %v39_v0, -inf  ;;  %v229_v57 = vmov 1.1   ;;  %vm130_vm11 = vcmask 1040384  }
  0x1b   :  { %v91_v3 = vsel %vm41_vm0, %v40_v1, -inf  ;;  %v43_v4 = vrot.slane %v42_v2, 4  ;;  %v80_v14 = vshrl.u32 %v79_v9, 7  ;;  %v68_v34 = vmul.f32 %v40_v1, %v39_v0  ;;  %v117_v62 = vld [vmem:[%s279_s2] sm:$0x1]  ;;  %s230_s2 = smov [#allocation7]  }
  0x1c   :  { %v92_v5 = vrot.slane %v91_v3, 4  ;;  %v61_v36 = vsel %vm41_vm0, %v40_v1, 0.0  ;;  %s141_s22 = sshll.u32 %s230_s2, 4  ;;  %s142_s22 = int_to_ptr.vmem [resolvable:$true] %s141_s22 }
  0x1d   :  { %v44_v6 = vmax.f32 %v42_v2, %v43_v4  ;;  %v81_v19 = vcvt.s32.f32 %v80_v14  ;;  %v69_v40 = vsel %vm41_vm0, %v68_v34, 0.0  ;;  %v62_v42 = vrot.slane %v61_v36, 4  ;;  %s200_s23 = scalar_lea.vmem %s142_s22, 16  ;;  %s204_s24 = scalar_lea.vmem %s142_s22, 32 }
  0x1e   :  { %v93_v7 = vmax.f32 %v91_v3, %v92_v5  ;;  %v70_v46 = vrot.slane %v69_v40, 4  ;;  %v118_v4 = vunpack.c.0.s8 %v117_v62  ;;  %v121_v5 = vand.u32 127, %v79_v9  ;;  %p201_p10 = scmp.ne.s32.totalorder %s142_s22, %s200_s23  ;;  %p205_p11 = scmp.lt.s32.totalorder %s142_s22, %s142_s22 }
  0x1f   :  { %v45_v8 = vrot.slane %v44_v6, 2  ;;  %v63_v48 = vadd.f32 %v62_v42, %v61_v36  ;;  %p206_p12 = scmp.lt.s32.totalorder %s204_s24, %s200_s23 }
  0x20   :  { %v94_v10 = vrot.slane %v93_v7, 2  ;;  %v71_v51 = vadd.f32 %v70_v46, %v69_v40  ;;  %vm119_vm8 = vcmp.eq.s32.totalorder %v118_v4, 0  ;;  %vm125_vm9 = vcmp.lt.s32.totalorder %v121_v5, 8 }
  0x21   :  { %v46_v11 = vmax.f32 %v44_v6, %v45_v8  ;;  %v64_v52 = vrot.slane %v63_v48, 2  ;;  %vm126_vm10 = vmand %vm119_vm8, %vm125_vm9  ;;  %p207_p13 = por %p206_p12, %p205_p11 }
  0x22   :  { %v95_v12 = vmax.f32 %v93_v7, %v94_v10  ;;  %v72_v53 = vrot.slane %v71_v51, 2 }
  0x23   :  { %v47_v13 = vrot.slane %v46_v11, 1  ;;  %v65_v54 = vadd.f32 %v64_v52, %v63_v48  ;;  %p208_p0 = pnand %p207_p13, %p201_p10 }
  0x24   :  { %v96_v15 = vrot.slane %v95_v12, 1  ;;  %v73_v59 = vadd.f32 %v72_v53, %v71_v51 }
  0x25   :  { %v260_v16 = vmax.f32 %v46_v11, %v47_v13  ;;  %v66_v61 = vrot.slane %v65_v54, 1 }
  0x26   :  { %v97_v17 = vmax.f32 %v95_v12, %v96_v15  ;;  %v74_v63 = vrot.slane %v73_v59, 1 }
  0x27   :  { %v49_v18 = vsub.f32 %v39_v0, %v260_v16  ;;  %vm82_vm1 = vcmp.eq.f32.partialorder %v39_v0, %v260_v16  ;;  %v67_v3 = vadd.f32 %v66_v61, %v65_v54 }
  0x28   :  { %vm98_vm2 = vcmp.eq.f32.partialorder %v40_v1, %v97_v17  ;;  %v83_v21 = vsel %vm82_vm1, %v81_v19, 7.0  ;;  %v75_v7 = vadd.f32 %v74_v63, %v73_v59 }
  0x29   :  { %v50_v20 = vmul.f32 1.442695, %v49_v18  ;;  %v99_v22 = vsel %vm98_vm2, %v81_v19, 7.0  ;;  %v84_v23 = vsel %vm41_vm0, %v83_v21, inf }
  0x2a   :  { %v100_v24 = vsel %vm41_vm0, %v99_v22, inf  ;;  %v85_v25 = vrot.slane %v84_v23, 4 }
  0x2b   :  { %156 = vpow2.f32 %v50_v20  ;;  %v101_v26 = vrot.slane %v100_v24, 4 }
  0x2c   :  { %v86_v27 = vmin.f32 %v84_v23, %v85_v25 }
  0x2d   :  { %v102_v28 = vmin.f32 %v100_v24, %v101_v26 }
  0x2e   :  { %v87_v31 = vrot.slane %v86_v27, 2 }
  0x2f   :  { %v103_v32 = vrot.slane %v102_v28, 2 }
  0x30   :  { %v88_v37 = vmin.f32 %v86_v27, %v87_v31 }
  0x31   :  { %v104_v38 = vmin.f32 %v102_v28, %v103_v32 }
  0x32   :  { %v89_v43 = vrot.slane %v88_v37, 1 }
  0x33   :  { %v105_v44 = vrot.slane %v104_v38, 1 }
  0x34   :  { %v90_v49 = vmin.f32 %v88_v37, %v89_v43 }
  0x35   :  { %v106_v50 = vmin.f32 %v104_v38, %v105_v44 }
  0x36   :  { %vm112_vm4 = vcmp.eq.f32.partialorder %v90_v49, 2.0  ;;  %vm109_vm5 = vcmp.eq.f32.partialorder %v90_v49, 0.0 }
  0x37   :  { %vm110_vm3 = vcmp.eq.f32.partialorder %v106_v50, 2.0  ;;  %v113_v58 = vsel %vm112_vm4, 1.3, %v229_v57  ;;  %vm108_vm6 = vcmp.eq.f32.partialorder %v106_v50, 0.0  ;;  %vm107_vm7 = vcmp.eq.f32.partialorder %v90_v49, %v106_v50 }
  0x38   :  { %v157_v29 = vpop.eup %156  ;;  %v111_v56 = vsel %vm110_vm3, 1.02, %v228_v55 }
  0x39   :  { %v52_v30 = vsel %vm41_vm0, %v157_v29, 0.0  ;;  %v114_v60 = vsel %vm109_vm5, %v111_v56, %v113_v58 }
  0x3a   :  { %v53_v33 = vrot.slane %v52_v30, 4  ;;  %v115_v0 = vsel %vm108_vm6, 0.25, %v114_v60 }
  0x3b   :  { %v116_v6 = vsel %vm107_vm7, 0.0, %v115_v0 }
  0x3c   :  { %v54_v35 = vadd.f32 %v53_v33, %v52_v30  ;;  %v127_v11 = vadd.f32 1.0, %v116_v6 }
  0x3e   :  { %v55_v39 = vrot.slane %v54_v35, 2 }
  0x40   :  { %v56_v41 = vadd.f32 %v55_v39, %v54_v35 }
  0x42   :  { %v57_v45 = vrot.slane %v56_v41, 1 }
  0x44   :  { %v58_v47 = vadd.f32 %v57_v45, %v56_v41 }
  0x46   :  { %158 = vlog2.f32 %v58_v47 }
  0x53   :  { %v159_v1 = vpop.eup %158 }
  0x54   :  { %v60_v2 = vmul.f32 0.6931472, %v159_v1 }
  0x56   :  { %v76_v8 = vadd.f32 %v60_v2, %v260_v16 }
  0x58   :  { %v77_v10 = vmul.f32 %v76_v8, %v67_v3 }
  0x5a   :  { %v78_v12 = vsub.f32 %v77_v10, %v75_v7 }
  0x5c   :  { %v128_v13 = vmul.f32 %v127_v11, %v78_v12 }
  0x5e   :  { %v129_v14 = vsel %vm126_vm10, %v128_v13, 0.0 }
  0x5f   :  { %v131_v15 = vsel %vm130_vm11, %v129_v14, 0.0 }
  0x60   :  { %132 = vadd.xlane.f32.xlu0 %v131_v15 }
  0xe9   :  { %v133_v17 = vpop.xlane.xlu0 %132 }
  0xea   :  { %134 = vst [vmem:[#allocation7] sm:$0x1] %v133_v17 }
  0xeb   :  { %211 = shalt.err (!%p208_p0)
}
  0xec   :  { %144 = dma.vmem_to_hbm [thread:$0]  %s142_s22, 16, %s280_s3, [#allocation4]  }
  0xed   :  { %224 = dma.done.wait [#allocation4], 16  }
  0xee   :  { %225 = vsyncadd [#allocation4], 4294967280 }
  0xef   :  { %148 = vsyncpa [#allocation3], 1 }
  0xf0   :  { %149 = vsyncpa [#allocation6], 1 }
  0xf1   :  { %150 = vsyncpa [#allocation4], 1 }

</bundles_post_ra>
